<compile_context>
chip_gen: v5e
topology: v5e:2x2
jax: 0.10.0
libtpu: 0.0.40
codegen_flags: <defaults>
</compile_context>

<pallas_src>
import math
import functools

import jax
import jax.numpy as jnp
from jax.experimental import pallas as pl
from jax.experimental.pallas import tpu as pltpu

_LN_EPS = 1e-5


def _vmem_limit_bytes():
    """Generation-dependent scoped-VMEM budget: ~75% of per-core VMEM, capped at
    100 MiB (v5e/v6e -> ~96 MiB, v7x -> 48 MiB); conservative fallback."""
    try:
        cap = int(pltpu.get_tpu_info().vmem_capacity_bytes)
    except Exception:
        cap = 64 * 1024 * 1024
    return max(32 * 1024 * 1024, min((cap * 3) // 4, 100 * 1024 * 1024))


def _layernorm_f32(x, w, b, eps=_LN_EPS):
    # x: [R, D] f32, w/b: [1, D] f32
    mean = jnp.mean(x, axis=-1, keepdims=True)
    var = jnp.mean((x - mean) ** 2, axis=-1, keepdims=True)
    return (x - mean) * jax.lax.rsqrt(var + eps) * w + b


def _pick_tile(total, target, multiple):
    """Largest divisor of `total` that is <= target and a multiple of `multiple`;
    falls back to `total` (full dim is always a legal block)."""
    if total <= target:
        return total
    c = (target // multiple) * multiple
    while c >= multiple:
        if total % c == 0:
            return c
        c -= multiple
    return total


# ----------------------------------------------------------------------------
# Kernel 1: fused Q|K|V projection, emitting head-major [B, H, S, d_k]
# ----------------------------------------------------------------------------
def _qkv_proj_kernel(x_ref, wqkv_ref, bqkv_ref, q_ref, k_ref, v_ref,
                     *, d_model, num_heads, d_k, compute_dtype):
    x = x_ref[0].astype(compute_dtype)                                  # [TS, D]
    qkv = jnp.dot(x, wqkv_ref[...], preferred_element_type=jnp.float32)
    qkv = (qkv + bqkv_ref[...]).astype(q_ref.dtype)                     # [TS, 3D]
    ts = x.shape[0]
    # Split + head-major relayout once per row tile in VMEM — replaces three
    # full HBM transpose passes that used to sit between kernels 1 and 2.
    for sec, ref in enumerate((q_ref, k_ref, v_ref)):
        t = qkv[:, sec * d_model:(sec + 1) * d_model]                   # [TS, D]
        ref[0] = jnp.transpose(t.reshape(ts, num_heads, d_k), (1, 0, 2))


# ----------------------------------------------------------------------------
# Kernel 2: flash attention (online softmax over KV blocks, batched heads)
#           + per-head output projection + residual + LayerNorm1
# ----------------------------------------------------------------------------
def _attn_ln1_kernel(x_ref, q_ref, k_ref, v_ref, wo_ref, bo_ref, g1_ref, b1_ref,
                     o_ref, m_sc, l_sc, acc_sc,
                     *, approx_recip, compute_dtype, exp_dtype):
    ki = pl.program_id(2)

    @pl.when(ki == 0)
    def _init():
        m_sc[...] = jnp.full(m_sc.shape, -jnp.inf, jnp.float32)
        l_sc[...] = jnp.zeros(l_sc.shape, jnp.float32)
        acc_sc[...] = jnp.zeros(acc_sc.shape, jnp.float32)

    q = q_ref[0]                      # [H, TQ,  d_k] (1/sqrt(d_k) folded into Wq)
    k = k_ref[0]                      # [H, TKV, d_k]
    v = v_ref[0]                      # [H, TKV, d_k]

    # All heads in one batched, lane-aligned contraction over d_k.
    s = jnp.einsum("hqd,hkd->hqk", q, k,
                   preferred_element_type=jnp.float32)          # [H, TQ, TKV] f32

    m_prev = m_sc[...]
    m_new = jnp.maximum(m_prev, jnp.max(s, axis=-1, keepdims=True))
    alpha = jnp.exp(m_prev - m_new)
    # exp in exp_dtype (bf16 on v6e/v7x roughly doubles EUP throughput in this
    # EUP-bound loop); running sums are forced to accumulate in f32.
    p = jnp.exp((s - m_new).astype(exp_dtype))
    l_sc[...] = alpha * l_sc[...] + jnp.sum(p, axis=-1, keepdims=True,
                                            dtype=jnp.float32)
    acc_sc[...] = alpha * acc_sc[...] + jnp.einsum(
        "hqk,hkd->hqd", p.astype(compute_dtype), v,
        preferred_element_type=jnp.float32)
    m_sc[...] = m_new

    @pl.when(ki == pl.num_programs(2) - 1)
    def _finalize():
        inv_l = pl.reciprocal(l_sc[...], approx=approx_recip)   # EUP slot if approx
        ctx = (acc_sc[...] * inv_l).astype(compute_dtype)       # [H, TQ, d_k]
        num_heads = ctx.shape[0]
        # Output projection as per-head [TQ,d_k] x [d_k,D] matmuls against the
        # [H,d_k,D]-reshaped Wo: no transpose/reshape of ctx, so no
        # (8,128)-crossing relayout copies on the epilogue critical path.
        attn = jnp.dot(ctx[0], wo_ref[0], preferred_element_type=jnp.float32)
        for hh in range(1, num_heads):
            attn = attn + jnp.dot(ctx[hh], wo_ref[hh],
                                  preferred_element_type=jnp.float32)
        attn = attn + bo_ref[...]
        res = x_ref[0].astype(jnp.float32) + attn
        o_ref[0] = _layernorm_f32(res, g1_ref[...], b1_ref[...]).astype(o_ref.dtype)


# ----------------------------------------------------------------------------
# Kernel 3: FFN + residual + LayerNorm2 (resident-weight and tiled variants)
# ----------------------------------------------------------------------------
def _ffn_ln2_resident_kernel(h_ref, w1_ref, b1_ref, w2_ref, b2_ref, g2_ref,
                             bb2_ref, o_ref, *, compute_dtype):
    h = h_ref[...]                                               # [TM, D]
    t = jnp.dot(h.astype(compute_dtype), w1_ref[...],
                preferred_element_type=jnp.float32) + b1_ref[...]
    t = jnp.maximum(t, 0.0)
    ff = jnp.dot(t.astype(compute_dtype), w2_ref[...],
                 preferred_element_type=jnp.float32) + b2_ref[...]
    y = h.astype(jnp.float32) + ff                               # residual from norm1
    o_ref[...] = _layernorm_f32(y, g2_ref[...], bb2_ref[...]).astype(o_ref.dtype)


def _ffn_ln2_tiled_kernel(h_ref, w1_ref, b1_ref, w2_ref, b2_ref, g2_ref,
                          bb2_ref, o_ref, acc_ref, *, compute_dtype):
    j = pl.program_id(1)

    @pl.when(j == 0)
    def _init():
        acc_ref[...] = jnp.zeros(acc_ref.shape, jnp.float32)

    h = h_ref[...]                                               # [TM, D]
    t = jnp.dot(h.astype(compute_dtype), w1_ref[...],
                preferred_element_type=jnp.float32) + b1_ref[...]   # [TM, TN]
    t = jnp.maximum(t, 0.0)
    acc_ref[...] += jnp.dot(t.astype(compute_dtype), w2_ref[...],
                            preferred_element_type=jnp.float32)     # [TM, D]

    @pl.when(j == pl.num_programs(1) - 1)
    def _finalize():
        ff = acc_ref[...] + b2_ref[...]
        # NOTE: re-reading h here is correct because its block index is
        # invariant over the reduction axis j.
        y = h_ref[...].astype(jnp.float32) + ff
        o_ref[...] = _layernorm_f32(y, g2_ref[...], bb2_ref[...]).astype(o_ref.dtype)


# ----------------------------------------------------------------------------
# Wrapper
# ----------------------------------------------------------------------------
def encoder_layer(x, params, *, num_heads, compute_dtype=jnp.bfloat16,
                  softmax_exp_dtype=None):
    """x: [B, S, D] float32. params: dict of weights (see init_params).

    compute_dtype: dtype of matmul operands and inter-kernel activation
    (bf16 recommended on v6e/v7x; accumulation / softmax stats / layernorm are
    always f32)."""
    B, S, D = x.shape
    assert D % num_heads == 0
    d_k = D // num_heads
    d_inner = params["w1"].shape[1]
    R = B * S
    itemsize = jnp.dtype(compute_dtype).itemsize
    is_f32 = jnp.dtype(compute_dtype) == jnp.dtype(jnp.float32)
    approx_recip = not is_f32
    # Inter-kernel activation h: bf16 on the bf16 path (halves HBM traffic),
    # f32 on the f32 correctness path.
    h_dtype = jnp.dtype(compute_dtype)
    h_itemsize = jnp.dtype(h_dtype).itemsize
    if softmax_exp_dtype is None:
        # TODO(synk): force f32 here on v5e (no bf16 VPU/EUP, bf16 exp is emulated).
        softmax_exp_dtype = jnp.dtype(compute_dtype)

    vmem_limit = _vmem_limit_bytes()

    # Tile sizes (largest divisors; all satisfy the (8,128)-or-full-dim rule).
    TS = _pick_tile(S, 512, 8)                       # kernel-1 rows (per batch)
    TQ = _pick_tile(S, 256, 8)                       # attention query tile
    tkv_target = 512 if vmem_limit >= 80 * 1024 * 1024 else 256   # smaller on v7x
    TKV = _pick_tile(S, tkv_target, 8)               # KV rows per attention step
    TM = _pick_tile(R, max(8, min(512, R // 2)), 8)  # FFN rows (>=2 tiles for 2-TC v7x)
    TN = _pick_tile(d_inner, 512, 128)               # d_inner chunk (tiled FFN path)

    # Fold 1/sqrt(d_k) into the Q projection (free; removes a full [H,TQ,TKV]
    # VPU multiply from every KV step of the attention inner loop).
    scale = 1.0 / math.sqrt(d_k)
    wqkv = jnp.concatenate(
        [params["wq"] * scale, params["wk"], params["wv"]], axis=1
    ).astype(compute_dtype)                                           # [D, 3D]
    bqkv = jnp.concatenate(
        [params["bq"] * scale, params["bk"], params["bv"]], axis=1)   # [1, 3D] f32
    wo3 = params["wo"].reshape(num_heads, d_k, D).astype(compute_dtype)  # [H,d_k,D]
    bo = params["bo"]
    w1 = params["w1"].astype(compute_dtype)
    w2 = params["w2"].astype(compute_dtype)
    b1, b2 = params["b1"], params["b2"]
    g1, beta1 = params["ln1_w"], params["ln1_b"]
    g2, beta2 = params["ln2_w"], params["ln2_b"]

    # TODO(synk): grid-invariant weight blocks (index_map == (0,0)) could be
    # single-buffered via pipeline_mode=pl.Buffered(1) to halve their VMEM
    # footprint on v7x; left at the default double-buffering for portability.
    # TODO(synk): head-major q/k/v stores have lane width d_k (<128 -> masked);
    # packing heads along lanes would make them lane-dense.

    # ---------------- kernel 1: fused QKV projection (head-major out) ---------
    qh, kh, vh = pl.pallas_call(
        functools.partial(_qkv_proj_kernel, d_model=D, num_heads=num_heads,
                          d_k=d_k, compute_dtype=compute_dtype),
        out_shape=[jax.ShapeDtypeStruct((B, num_heads, S, d_k), compute_dtype)] * 3,
        grid_spec=pltpu.PrefetchScalarGridSpec(
            num_scalar_prefetch=0,
            grid=(B, S // TS),
            in_specs=[
                pl.BlockSpec((1, TS, D), lambda b, si: (b, si, 0)),     # x rows
                pl.BlockSpec((D, 3 * D), lambda b, si: (0, 0)),         # wq|wk|wv
                pl.BlockSpec((1, 3 * D), lambda b, si: (0, 0)),         # bq|bk|bv
            ],
            out_specs=[
                pl.BlockSpec((1, num_heads, TS, d_k), lambda b, si: (b, 0, si, 0))
            ] * 3,
        ),
        compiler_params=pltpu.CompilerParams(
            dimension_semantics=("parallel", "parallel"),
            vmem_limit_bytes=vmem_limit,
        ),
        cost_estimate=pl.CostEstimate(
            flops=int(6 * B * S * D * D),
            transcendentals=0,
            bytes_accessed=int(B * S * D * 4 + 3 * D * D * itemsize
                               + 3 * D * 4 + 3 * B * S * D * itemsize),
        ),
    )(x, wqkv, bqkv)

    # ---------------- kernel 2: attention + out-proj + residual + LN1 ---------
    h = pl.pallas_call(
        functools.partial(_attn_ln1_kernel,
                          approx_recip=approx_recip,
                          compute_dtype=compute_dtype,
                          exp_dtype=softmax_exp_dtype),
        out_shape=jax.ShapeDtypeStruct((B, S, D), h_dtype),
        grid_spec=pltpu.PrefetchScalarGridSpec(
            num_scalar_prefetch=0,
            grid=(B, S // TQ, S // TKV),
            in_specs=[
                pl.BlockSpec((1, TQ, D), lambda b, qi, ki: (b, qi, 0)),                  # x (residual)
                pl.BlockSpec((1, num_heads, TQ, d_k), lambda b, qi, ki: (b, 0, qi, 0)),   # q
                pl.BlockSpec((1, num_heads, TKV, d_k), lambda b, qi, ki: (b, 0, ki, 0)),  # k
                pl.BlockSpec((1, num_heads, TKV, d_k), lambda b, qi, ki: (b, 0, ki, 0)),  # v
                pl.BlockSpec((num_heads, d_k, D), lambda b, qi, ki: (0, 0, 0)),           # wo [H,d_k,D]
                pl.BlockSpec((1, D), lambda b, qi, ki: (0, 0)),                           # bo
                pl.BlockSpec((1, D), lambda b, qi, ki: (0, 0)),                           # ln1 gamma
                pl.BlockSpec((1, D), lambda b, qi, ki: (0, 0)),                           # ln1 beta
            ],
            out_specs=pl.BlockSpec((1, TQ, D), lambda b, qi, ki: (b, qi, 0)),
            scratch_shapes=[
                pltpu.VMEM((num_heads, TQ, 1), jnp.float32),    # running max
                pltpu.VMEM((num_heads, TQ, 1), jnp.float32),    # running denom
                pltpu.VMEM((num_heads, TQ, d_k), jnp.float32),  # context accumulator
            ],
        ),
        compiler_params=pltpu.CompilerParams(
            dimension_semantics=("parallel", "parallel", "arbitrary"),
            vmem_limit_bytes=vmem_limit,
        ),
        cost_estimate=pl.CostEstimate(
            flops=int(4 * B * num_heads * S * S * d_k + 2 * B * S * D * D),
            transcendentals=int(B * num_heads * S * S),
            bytes_accessed=int(B * S * D * 4 + 3 * B * S * D * itemsize
                               + D * D * itemsize + B * S * D * h_itemsize),
        ),
    )(x, qh, kh, vh, wo3, bo, g1, beta1)

    # ---------------- kernel 3: FFN + residual + LN2 ----------------
    h2d = h.reshape(R, D)

    # Keep w1/w2 fully VMEM-resident when they (double-buffered) plus the
    # row-tile intermediates fit the budget; otherwise tile d_inner on a
    # reduction grid axis (weight streaming amortized by the large TM).
    ffn_resident_bytes = (2 * 2 * D * d_inner * itemsize          # w1+w2, 2x buffers
                          + TM * d_inner * (4 + itemsize)         # relu intermediate
                          + 4 * TM * D * (h_itemsize + 4))        # h / out blocks
    use_resident = ffn_resident_bytes <= int(vmem_limit * 0.7)

    if use_resident:
        out2d = pl.pallas_call(
            functools.partial(_ffn_ln2_resident_kernel, compute_dtype=compute_dtype),
            out_shape=jax.ShapeDtypeStruct((R, D), x.dtype),
            grid_spec=pltpu.PrefetchScalarGridSpec(
                num_scalar_prefetch=0,
                grid=(R // TM,),
                in_specs=[
                    pl.BlockSpec((TM, D), lambda i: (i, 0)),        # h
                    pl.BlockSpec((D, d_inner), lambda i: (0, 0)),   # w1 (resident)
                    pl.BlockSpec((1, d_inner), lambda i: (0, 0)),   # b1
                    pl.BlockSpec((d_inner, D), lambda i: (0, 0)),   # w2 (resident)
                    pl.BlockSpec((1, D), lambda i: (0, 0)),         # b2
                    pl.BlockSpec((1, D), lambda i: (0, 0)),         # ln2 gamma
                    pl.BlockSpec((1, D), lambda i: (0, 0)),         # ln2 beta
                ],
                out_specs=pl.BlockSpec((TM, D), lambda i: (i, 0)),
            ),
            compiler_params=pltpu.CompilerParams(
                dimension_semantics=("parallel",),
                vmem_limit_bytes=vmem_limit,
            ),
            cost_estimate=pl.CostEstimate(
                flops=int(4 * R * D * d_inner),
                transcendentals=0,
                bytes_accessed=int(R * D * (h_itemsize + 4)
                                   + 2 * D * d_inner * itemsize),
            ),
        )(h2d, w1, b1, w2, b2, g2, beta2)
    else:
        out2d = pl.pallas_call(
            functools.partial(_ffn_ln2_tiled_kernel, compute_dtype=compute_dtype),
            out_shape=jax.ShapeDtypeStruct((R, D), x.dtype),
            grid_spec=pltpu.PrefetchScalarGridSpec(
                num_scalar_prefetch=0,
                grid=(R // TM, d_inner // TN),
                in_specs=[
                    pl.BlockSpec((TM, D), lambda i, j: (i, 0)),   # h (invariant over j)
                    pl.BlockSpec((D, TN), lambda i, j: (0, j)),   # w1 chunk
                    pl.BlockSpec((1, TN), lambda i, j: (0, j)),   # b1 chunk
                    pl.BlockSpec((TN, D), lambda i, j: (j, 0)),   # w2 chunk
                    pl.BlockSpec((1, D), lambda i, j: (0, 0)),    # b2
                    pl.BlockSpec((1, D), lambda i, j: (0, 0)),    # ln2 gamma
                    pl.BlockSpec((1, D), lambda i, j: (0, 0)),    # ln2 beta
                ],
                out_specs=pl.BlockSpec((TM, D), lambda i, j: (i, 0)),
                scratch_shapes=[pltpu.VMEM((TM, D), jnp.float32)],
            ),
            compiler_params=pltpu.CompilerParams(
                dimension_semantics=("parallel", "arbitrary"),
                vmem_limit_bytes=vmem_limit,
            ),
            cost_estimate=pl.CostEstimate(
                flops=int(4 * R * D * d_inner),
                transcendentals=0,
                bytes_accessed=int(R * D * (h_itemsize + 4)
                                   + (R // TM) * 2 * D * d_inner * itemsize),
            ),
        )(h2d, w1, b1, w2, b2, g2, beta2)

    return out2d.reshape(B, S, D)


# ----------------------------------------------------------------------------
# Parameter init + pure-JAX reference
# ----------------------------------------------------------------------------
def init_params(key, d_model, d_inner):
    """Deterministic synthetic parameter init (not a checkpoint load)."""
    ks = jax.random.split(key, 12)

    def lin(k, fan_in, fan_out):
        bound = 1.0 / math.sqrt(fan_in)
        kw, kb = jax.random.split(k)
        w = jax.random.uniform(kw, (fan_in, fan_out), jnp.float32, -bound, bound)
        b = jax.random.uniform(kb, (1, fan_out), jnp.float32, -bound, bound)
        return w, b

    wq, bq = lin(ks[0], d_model, d_model)
    wk, bk = lin(ks[1], d_model, d_model)
    wv, bv = lin(ks[2], d_model, d_model)
    wo, bo = lin(ks[3], d_model, d_model)
    w1, b1 = lin(ks[4], d_model, d_inner)
    w2, b2 = lin(ks[5], d_inner, d_model)
    return dict(
        wq=wq, bq=bq, wk=wk, bk=bk, wv=wv, bv=bv, wo=wo, bo=bo,
        ln1_w=jnp.ones((1, d_model), jnp.float32),
        ln1_b=jnp.zeros((1, d_model), jnp.float32),
        w1=w1, b1=b1, w2=w2, b2=b2,
        ln2_w=jnp.ones((1, d_model), jnp.float32),
        ln2_b=jnp.zeros((1, d_model), jnp.float32),
    )


def encoder_layer_ref(x, params, *, num_heads):
    """Pure-JAX f32 reference for correctness check."""
    B, S, D = x.shape
    d_k = D // num_heads
    q = x @ params["wq"] + params["bq"]
    k = x @ params["wk"] + params["bk"]
    v = x @ params["wv"] + params["bv"]

    def split(t):  # [B,S,D] -> [B,H,S,dk]
        return t.reshape(B, S, num_heads, d_k).transpose(0, 2, 1, 3)

    qh, kh, vh = split(q), split(k), split(v)
    s = jnp.einsum("bhqd,bhkd->bhqk", qh, kh) * (1.0 / math.sqrt(d_k))
    p = jax.nn.softmax(s, axis=-1)
    a = jnp.einsum("bhqk,bhkd->bhqd", p, vh)
    a = a.transpose(0, 2, 1, 3).reshape(B, S, D)
    attn = a @ params["wo"] + params["bo"]

    def ln(t, w, b, eps=_LN_EPS):
        m = jnp.mean(t, axis=-1, keepdims=True)
        var = jnp.mean((t - m) ** 2, axis=-1, keepdims=True)
        return (t - m) * jax.lax.rsqrt(var + eps) * w + b

    n1 = ln(x + attn, params["ln1_w"], params["ln1_b"])
    ff = jnp.maximum(n1 @ params["w1"] + params["b1"], 0.0) @ params["w2"] + params["b2"]
    return ln(n1 + ff, params["ln2_w"], params["ln2_b"])


if __name__ == "__main__":
    B, S, D, D_INNER, H = 2, 8, 32, 64, 4

    key = jax.random.PRNGKey(0)
    kx, kp = jax.random.split(key)
    x = jax.random.normal(kx, (B, S, D), jnp.float32)
    params = init_params(kp, D, D_INNER)

    ref = encoder_layer_ref(x, params, num_heads=H)

    # f32 operand path: tight correctness check against the pure-JAX reference.
    out_f32 = jax.block_until_ready(
        encoder_layer(x, params, num_heads=H, compute_dtype=jnp.float32))
    assert out_f32.shape == (B, S, D)
    assert jnp.allclose(out_f32, ref, atol=1e-3, rtol=1e-3), \
        "f32 kernel mismatch vs JAX reference"

    # bf16 operand path (recommended on v6e/v7x): loose check (f32 accumulation).
    out_bf16 = jax.block_until_ready(
        encoder_layer(x, params, num_heads=H, compute_dtype=jnp.bfloat16))
    assert out_bf16.shape == (B, S, D)
    assert jnp.allclose(out_bf16.astype(jnp.float32), ref, atol=1e-1, rtol=1e-1), \
        "bf16 kernel deviates too far from reference"

    print("KERNEL_OK")
</pallas_src>

<mosaic_0001>
module attributes {stable_mosaic.version = 11 : i64} {
  func.func @_qkv_proj_kernel(%arg0: i32, %arg1: i32, %arg2: memref<1x8x32xf32, #tpu.memory_space<vmem>>, %arg3: memref<32x96xf32, #tpu.memory_space<vmem>>, %arg4: memref<1x96xf32, #tpu.memory_space<vmem>>, %arg5: memref<1x4x8x8xf32, #tpu.memory_space<vmem>>, %arg6: memref<1x4x8x8xf32, #tpu.memory_space<vmem>>, %arg7: memref<1x4x8x8xf32, #tpu.memory_space<vmem>>) attributes {dimension_semantics = [#tpu.dimension_semantics<parallel>, #tpu.dimension_semantics<parallel>], iteration_bounds = array<i64: 2, 1>, scalar_prefetch = 0 : i64, scratch_operands = 0 : i64, tpu.core_type = #tpu.core_type<tc>, window_params = [{transform_indices = @transform_0, window_bounds = array<i64: 1, 8, 32>}, {pipeline_mode = #tpu.pipeline_mode<synchronous>, transform_indices = @transform_1, window_bounds = array<i64: 32, 96>}, {pipeline_mode = #tpu.pipeline_mode<synchronous>, transform_indices = @transform_2, window_bounds = array<i64: 1, 96>}, {transform_indices = @transform_3, window_bounds = array<i64: 1, 4, 8, 8>}, {transform_indices = @transform_4, window_bounds = array<i64: 1, 4, 8, 8>}, {transform_indices = @transform_5, window_bounds = array<i64: 1, 4, 8, 8>}]} {
    %c0 = arith.constant 0 : index
    %c0_0 = arith.constant 0 : index
    %c0_1 = arith.constant 0 : index
    %0 = vector.load %arg2[%c0, %c0_0, %c0_1] : memref<1x8x32xf32, #tpu.memory_space<vmem>>, vector<1x8x32xf32>
    %1 = vector.shape_cast %0 : vector<1x8x32xf32> to vector<8x32xf32>
    %c0_2 = arith.constant 0 : index
    %c0_3 = arith.constant 0 : index
    %2 = vector.load %arg3[%c0_2, %c0_3] : memref<32x96xf32, #tpu.memory_space<vmem>>, vector<32x96xf32>
    %cst = arith.constant dense<0.000000e+00> : vector<8x96xf32>
    %3 = tpu.matmul %1, %2, %cst {dimension_numbers = #tpu.dot_dimension_numbers<[1], [0], [0], [1], [0, 0, 1, 1], [], []>} : vector<8x32xf32>, vector<32x96xf32>, vector<8x96xf32> -> vector<8x96xf32>
    %c0_4 = arith.constant 0 : index
    %c0_5 = arith.constant 0 : index
    %4 = vector.load %arg4[%c0_4, %c0_5] : memref<1x96xf32, #tpu.memory_space<vmem>>, vector<1x96xf32>
    %5 = vector.broadcast %4 : vector<1x96xf32> to vector<8x96xf32>
    %6 = arith.addf %3, %5 : vector<8x96xf32>
    %7 = vector.extract_strided_slice %6 {offsets = [0, 0], sizes = [8, 32], strides = [1, 1]} : vector<8x96xf32> to vector<8x32xf32>
    %8 = vector.shape_cast %7 : vector<8x32xf32> to vector<8x4x8xf32>
    %9 = tpu.transpose %8, [1, 0, 2] : vector<8x4x8xf32> -> vector<4x8x8xf32>
    %c0_6 = arith.constant 0 : index
    %c0_7 = arith.constant 0 : index
    %c0_8 = arith.constant 0 : index
    %c0_9 = arith.constant 0 : index
    %10 = vector.load %arg5[%c0_6, %c0_7, %c0_8, %c0_9] : memref<1x4x8x8xf32, #tpu.memory_space<vmem>>, vector<1x4x8x8xf32>
    %11 = vector.shape_cast %10 : vector<1x4x8x8xf32> to vector<4x8x8xf32>
    %12 = vector.shape_cast %9 : vector<4x8x8xf32> to vector<1x4x8x8xf32>
    tpu.vector_store %arg5[%c0_6, %c0_7, %c0_8, %c0_9], %12 {strides = array<i32>} : memref<1x4x8x8xf32, #tpu.memory_space<vmem>>, vector<1x4x8x8xf32>,
    %13 = vector.extract_strided_slice %6 {offsets = [0, 32], sizes = [8, 32], strides = [1, 1]} : vector<8x96xf32> to vector<8x32xf32>
    %14 = vector.shape_cast %13 : vector<8x32xf32> to vector<8x4x8xf32>
    %15 = tpu.transpose %14, [1, 0, 2] : vector<8x4x8xf32> -> vector<4x8x8xf32>
    %c0_10 = arith.constant 0 : index
    %c0_11 = arith.constant 0 : index
    %c0_12 = arith.constant 0 : index
    %c0_13 = arith.constant 0 : index
    %16 = vector.load %arg6[%c0_10, %c0_11, %c0_12, %c0_13] : memref<1x4x8x8xf32, #tpu.memory_space<vmem>>, vector<1x4x8x8xf32>
    %17 = vector.shape_cast %16 : vector<1x4x8x8xf32> to vector<4x8x8xf32>
    %18 = vector.shape_cast %15 : vector<4x8x8xf32> to vector<1x4x8x8xf32>
    tpu.vector_store %arg6[%c0_10, %c0_11, %c0_12, %c0_13], %18 {strides = array<i32>} : memref<1x4x8x8xf32, #tpu.memory_space<vmem>>, vector<1x4x8x8xf32>,
    %19 = vector.extract_strided_slice %6 {offsets = [0, 64], sizes = [8, 32], strides = [1, 1]} : vector<8x96xf32> to vector<8x32xf32>
    %20 = vector.shape_cast %19 : vector<8x32xf32> to vector<8x4x8xf32>
    %21 = tpu.transpose %20, [1, 0, 2] : vector<8x4x8xf32> -> vector<4x8x8xf32>
    %c0_14 = arith.constant 0 : index
    %c0_15 = arith.constant 0 : index
    %c0_16 = arith.constant 0 : index
    %c0_17 = arith.constant 0 : index
    %22 = vector.load %arg7[%c0_14, %c0_15, %c0_16, %c0_17] : memref<1x4x8x8xf32, #tpu.memory_space<vmem>>, vector<1x4x8x8xf32>
    %23 = vector.shape_cast %22 : vector<1x4x8x8xf32> to vector<4x8x8xf32>
    %24 = vector.shape_cast %21 : vector<4x8x8xf32> to vector<1x4x8x8xf32>
    tpu.vector_store %arg7[%c0_14, %c0_15, %c0_16, %c0_17], %24 {strides = array<i32>} : memref<1x4x8x8xf32, #tpu.memory_space<vmem>>, vector<1x4x8x8xf32>,
    return
  }
  func.func @transform_0(%arg0: i32, %arg1: i32) -> (i32, i32, i32) {
    %c0_i32 = arith.constant 0 : i32
    %c0_i32_0 = arith.constant 0 : i32
    return %arg0, %arg1, %c0_i32 : i32, i32, i32
  }
  func.func @transform_1(%arg0: i32, %arg1: i32) -> (i32, i32) {
    %c0_i32 = arith.constant 0 : i32
    %c0_i32_0 = arith.constant 0 : i32
    %c0_i32_1 = arith.constant 0 : i32
    return %c0_i32, %c0_i32_0 : i32, i32
  }
  func.func @transform_2(%arg0: i32, %arg1: i32) -> (i32, i32) {
    %c0_i32 = arith.constant 0 : i32
    %c0_i32_0 = arith.constant 0 : i32
    %c0_i32_1 = arith.constant 0 : i32
    return %c0_i32, %c0_i32_0 : i32, i32
  }
  func.func @transform_3(%arg0: i32, %arg1: i32) -> (i32, i32, i32, i32) {
    %c0_i32 = arith.constant 0 : i32
    %c0_i32_0 = arith.constant 0 : i32
    %c0_i32_1 = arith.constant 0 : i32
    return %arg0, %c0_i32, %arg1, %c0_i32_0 : i32, i32, i32, i32
  }
  func.func @transform_4(%arg0: i32, %arg1: i32) -> (i32, i32, i32, i32) {
    %c0_i32 = arith.constant 0 : i32
    %c0_i32_0 = arith.constant 0 : i32
    %c0_i32_1 = arith.constant 0 : i32
    return %arg0, %c0_i32, %arg1, %c0_i32_0 : i32, i32, i32, i32
  }
  func.func @transform_5(%arg0: i32, %arg1: i32) -> (i32, i32, i32, i32) {
    %c0_i32 = arith.constant 0 : i32
    %c0_i32_0 = arith.constant 0 : i32
    %c0_i32_1 = arith.constant 0 : i32
    return %arg0, %c0_i32, %arg1, %c0_i32_0 : i32, i32, i32, i32
  }
}

</mosaic_0001>

<bundles_post_ra>
// kernel: tpu_custom_call.1
= control target key start
LH: loop header
LB: loop body
LE: loop exit
PB: predicated region body
PF: predicated region fallthrough
CT: control target
= control target key end

     0   :  { %s1666_s0 = inlined_call_operand.hbm [shape: f32[2,8,32], index: 0, kind: input, shape index: {}]   ;;  %s1667_s1 = inlined_call_operand.hbm [shape: f32[32,96], index: 1, kind: input, shape index: {}]   ;;  %s1668_s2 = inlined_call_operand.vmem [shape: f32[1,96], index: 2, kind: input, shape index: {}]   ;;  %s1669_s3 = inlined_call_operand.hbm [shape: f32[2,4,8,8], index: 3, kind: output, shape index: {0}]   ;;  %s1670_s4 = inlined_call_operand.hbm [shape: f32[2,4,8,8], index: 4, kind: output, shape index: {1}]   ;;  %s1671_s5 = inlined_call_operand.hbm [shape: f32[2,4,8,8], index: 5, kind: output, shape index: {2}]  }
   0x1   :  { %1673 = sst [smem:[#allocation15_spill]] %s1666_s0 }
   0x2   :  { %1674 = sst [smem:[#allocation16_spill]] %s1667_s1 }
   0x3   :  { %11 = vsyncpa [#allocation3], 0 }
   0x4   :  { %13 = vsyncpa [#allocation3 + $0x1], 0 }
   0x5   :  { %14 = vsyncpa [#allocation6], 0 }
   0x6   :  { %15 = vsyncpa [#allocation4], 0 }
   0x7   :  { %17 = vsyncpa [#allocation4 + $0x1], 0 }
   0x8   :  { %18 = vsyncpa [#allocation9], 0 }
   0x9   :  { %20 = vsyncpa [#allocation9 + $0x1], 0  ;;  %s1306_s18 = smov 0   ;;  %s1308_s19 = smov 0  }
   0xa   :  { %s1310_s20 = smov 0   ;;  %s1312_s21 = smov 0  }
   0xb   :  { %s1314_s22 = smov 0   ;;  %s1316_s23 = smov 0  }
   0xc LB: > { %s1337_s24 = sadd.s32 4294967295, %s1262_s23   ;;  %p935_p0 = scmp.ge.s32.totalorder %s1262_s23, 1  ;;  %s1262_s23 = sphi %s1316_s23, %s26_s23   ;;  %s1258_s22 = sphi %s1314_s22, %s1687_s22   ;;  %s1254_s21 = sphi %s1312_s21, %s1686_s21   ;;  %s1250_s20 = sphi %s1310_s20, %s1685_s20   ;;  %s1246_s19 = sphi %s1308_s19, %s1684_s19   ;;  %s1242_s18 = sphi %s1306_s18, %s1683_s18  }
   0xd   : > { %p61_p1 = scmp.eq.s32.totalorder %s1337_s24, 0  ;;  %p197_p2 = scmp.lt.s32.totalorder %s1262_s23, 3 }
   0xe   : > { %s1675_s1 = sld [smem:[#allocation16_spill]]  ;;  %s1264_s29 = smov [#allocation5]  }
   0xf   : > { %p1345_p3 = pnand %p935_p0, %p197_p2  ;;  %s210_s30 = sshll.u32 %s1264_s29, 4  ;;  %s211_s30 = int_to_ptr.vmem [resolvable:$true] %s210_s30 }
  0x10   : > { %p937_p6 = scmp.ge.s32.totalorder %s1262_s23, 2  ;;  %s1265_s6 = smov 128  }
  0x11   : > { %p973_p4 = pneg %p1345_p3  ;;  %s1266_s7 = smov 8  }
  0x12   : > { %s1672_s8 = sadd.s32 4294967294, %s1262_s23   ;;  %s38_s9 = sadd.s32 1, %s1258_s22 }
  0x13   : > { %p974_p5 = pnand %p973_p4, %p61_p1  ;;  %s47_s10 = sadd.s32 1, %s1250_s20 }
  0x14   : > { %s208_s27 = sshll.u32 %s1675_s1, 4  ;;  %p40_p7 = scmp.ge.s32.totalorder %s38_s9, 2  ;;  %s209_s27 = int_to_ptr.hbm [resolvable:$true] %s208_s27 }
  0x15   : > { %976 = dma.hbm_to_vmem [thread:$0]  (!%p974_p5), %s209_s27, 512, %s211_s30, [#allocation6], %s1265_s6, %s1265_s6, %s1266_s7  }
  0x16   : > { %p54_p8 = scmp.ne.s32.totalorder %s1250_s20, %s1246_s19  ;;  %p55_p9 = scmp.eq.s32.totalorder %s1262_s23, 0 }
  0x17   : > { %p60_p10 = scmp.ne.s32.totalorder %s1246_s19, %s1242_s18  ;;  %s1689_s9 = smov (%p40_p7, %s38_s9), 0 }
  0x18   : > { %p1364_p11 = por %p55_p9, %p54_p8  ;;  %s42_s13 = ssub.s32 %s1258_s22, %s1689_s9 }
  0x19   : > { %p1370_p12 = por %p61_p1, %p60_p10  ;;  %p128_p13 = scmp.eq.s32.totalorder %s1337_s24, 1 }
  0x1a   : > { %p45_p0 = scmp.eq.s32.totalorder %s42_s13, 0  ;;  %p134_p2 = scmp.eq.s32.totalorder %s1672_s8, 1 }
  0x1b   : > { %p1379_p4 = por %p128_p13, %p54_p8  ;;  %p992_p5 = scmp.lt.s32.totalorder %s1262_s23, 2 }
  0x1c   : > { %s1385_s15 = scalar_select %p45_p0, %s1250_s20, %s47_s10  }
  0x1d   : > { %p1387_p7 = por %p134_p2, %p60_p10  ;;  %s227_s17 = sand.u32 1, %s1250_s20  }
  0x1e   : > { %s938_s25 = sshll.u32 %s227_s17, 3  ;;  %s939_s26 = sshll.u32 %s1258_s22, 3 }
  0x1f   : > { %s1681_s0 = sld [smem:[#allocation15_spill]]  ;;  %s231_s6 = scalar_lea.vmem [#allocation2], %s938_s25 }
  0x20   : > { %s240_s7 = sshll.u32 %s231_s6, 4  ;;  %p978_p8 = pnand %p992_p5, %p1364_p11  ;;  %s241_s7 = int_to_ptr.vmem [resolvable:$true] %s240_s7 }
  0x21   : > { %s228_s10 = scalar_lea.sflag [#allocation3], %s227_s17  ;;  %s1401_s8 = sand.u32 (!%p1345_p3), 1, %s1246_s19  }
  0x22   : > { %s941_s27 = sshll.u32 (!%p1345_p3), %s1401_s8, 3 }
  0x23   : > { %249 = sbr.rel (%p1345_p3) target bundleno = 461 (0x1cd), region = 32  ;;  %s255_s25 = scalar_lea.vmem (!%p1345_p3), [#allocation2], %s941_s27 }
  0x25   : > { %s236_s30 = scalar_lea.hbm %s1681_s0, %s939_s26  ;;  %s252_s26 = scalar_lea.sflag (!%p1345_p3), [#allocation3], %s1401_s8 }
  0x26   : > { %s238_s13 = sshll.u32 %s236_s30, 4  ;;  %s239_s13 = int_to_ptr.hbm [resolvable:$true] %s238_s13 }
  0x27   : > { %980 = dma.hbm_to_vmem [thread:$0]  (!%p978_p8), %s239_s13, 128, %s241_s7, %s228_s10  }
  0x28   : > { %1225 = dma.done.wait (%p1370_p12), %s252_s26, 128  }
  0x29   : > { %1227 = vsyncadd (%p1370_p12), %s252_s26, 4294967168 }
  0x2a   : > { %1229 = dma.done.wait (%p61_p1), [#allocation6], 512  }
  0x2b   : > { %1231 = vsyncadd (%p61_p1), [#allocation6], 4294966784  ;;  %v302_v0 = vld [vmem:[#allocation5 + $0x18] sm:$0xff]  ;;  %v301_v1 = vld [vmem:[#allocation5 + $0x10] sm:$0xff]  ;;  %vm307_vm0 = vcmask 261120   ;;  %s1267_s12 = smov 64  }
  0x2c   : > { %323 = vmatpush.msra.mxu0 %v302_v0  ;;  %v300_v2 = vld [vmem:[#allocation5 + $0x8] sm:$0xff]  ;;  %v299_v3 = vld [vmem:[#allocation5] sm:$0xff]  ;;  %v298_v4 = vld [vmem:[%s255_s25] sm:$0xff]  ;;  %s1268_s17 = smov 104   ;;  %s1269_s29 = smov 112   ;;  %vm342_vm1 = vcmask 1047556  }
  0x2d   : > { %v1055_v5 = vld [vmem:[%s1668_s2] ss:$0 sm:$0xff]  ;;  %s1270_s30 = smov 96   ;;  %s1271_s6 = smov 120   ;;  %v1272_v8 = vmov 1983009808  }
  0x2e   : > { %324 = vmatpush.msra.mxu0 %v301_v1  ;;  %v347_v9 = vunpack.c.l.s4 %v1272_v8  ;;  %v1273_v17 = vmov 1934713408   ;;  %s1454_s7 = sshll.u32 %s1401_s8, 5  ;;  %vm452_vm2 = vcmask 64512   ;;  %s1473_s10 = sshll.u32 %s1254_s21, 5 }
  0x2f   : > { %v371_v18 = vunpack.c.l.s4 %v1273_v17  ;;  %s283_s13 = scalar_lea.vmem [#allocation7], %s1454_s7  ;;  %s732_s25 = scalar_lea.hbm %s1669_s3, %s1473_s10 }
  0x30   : > { %325 = vmatpush.msra.mxu0 %v300_v2  ;;  %v1419_v15 = vunpack.c.0.s8 %v347_v9  ;;  %s733_s28 = sshll.u32 %s283_s13, 4  ;;  %s735_s11 = sshll.u32 %s732_s25, 4  ;;  %s734_s28 = int_to_ptr.vmem [resolvable:$true] %s733_s28  ;;  %s736_s11 = int_to_ptr.hbm [resolvable:$true] %s735_s11 }
  0x31   : > { %v1424_v23 = vunpack.c.0.s8 %v371_v18 }
  0x32   : > { %326 = vmatpush.msra.mxu0 %v299_v3 }
  0x33   : > { %946 = vmatmul.msk.f32.vlgmr.msra.gmra.mxu0 %vm307_vm0, %v298_v4 }
  0xb0   : > { %v328_v6 = vpop.f32.mrf.mxu0 }
  0xb1   : > { %v329_v7 = vadd.f32 %v1055_v5, %v328_v6 }
  0xb3   : > { %583 = vrot.lane.b32.xlu2 %v329_v7, %s1267_s12  ;;  %338 = vrot.lane.b32.xlu1 %v329_v7, %s1268_s17  ;;  %v344_v13 = vrot.slane %v329_v7, 4  ;;  %s1130_s17 = sshra.s32 %s736_s11, 4  ;;  %s1131_s17 = int_to_ptr.hbm [resolvable:$true] %s1130_s17 }
  0xb4   : > { %335 = vrot.lane.b32.xlu0 %v329_v7, %s1269_s29  ;;  %s1132_s29 = scalar_lea.hbm %s1131_s17, 32  ;;  %p1137_p10 = scmp.lt.s32.totalorder %s1131_s17, %s1669_s3 }
  0xb5   : > { %p1133_p1 = scmp.ne.s32.totalorder %s1131_s17, %s1132_s29 }
  0xb7   : > { %p1134_p3 = pnand %p1133_p1, %p1379_p4 }
  0xb9   : > { %p1135_p9 = pneg %p1134_p3 }
  0xbb   : > { %457 = vrot.lane.b32.xlu1 %v329_v7, %s1270_s30 }
  0xbc   : > { %332 = vrot.lane.b32.xlu0 %v329_v7, %s1271_s6  ;;  %s1136_s6 = scalar_lea.hbm %s1669_s3, 64 }
  0xbd   : > { %p1138_p11 = scmp.lt.s32.totalorder %s1136_s6, %s1132_s29 }
  0xbf   : > { %p1139_p12 = por %p1138_p11, %p1137_p10 }
  0xc1   : > { %p1140_p13 = pnand %p1139_p12, %p1135_p9 }
 0x125   : > { %v339_v14 = vpop.permute.xlu1 %338 }
 0x126   : > { %v336_v10 = vpop.permute.xlu0 %335  ;;  %v354_v20 = vrot.slane %v339_v14, 4 }
 0x127   : > { %v341_v11 = vrot.slane %v336_v10, 4  ;;  %587 = vrot.lane.b32.xlu0 %v336_v10, %s1267_s12  ;;  %461 = vrot.lane.b32.xlu2 %v336_v10, %s1270_s30  ;;  %v345_v16 = vsel %vm342_vm1, %v336_v10, %v344_v13 }
 0x128   : > { %v353_v21 = vperm.slane %v345_v16, %v1419_v15 }
 0x129   : > { %v343_v12 = vsel %vm342_vm1, %v341_v11, %v329_v7 }
 0x12a   : > { %v349_v19 = vperm.slane %v343_v12, %v1419_v15  ;;  %v380_v29 = vrot.slane %v353_v21, 4 }
 0x12c   : > { %v368_v26 = vrot.slane %v349_v19, 4 }
 0x12e   : > { %v333_v22 = vpop.permute.xlu0 %332 }
 0x12f   : > { %v355_v24 = vsel %vm342_vm1, %v354_v20, %v333_v22  ;;  %v356_v25 = vrot.slane %v333_v22, 4  ;;  %463 = vrot.lane.b32.xlu2 %v339_v14, %s1270_s30  ;;  %585 = vrot.lane.b32.xlu0 %v333_v22, %s1267_s12 }
 0x130   : > { %v361_v27 = vperm.slane %v355_v24, %v1419_v15  ;;  %459 = vrot.lane.b32.xlu1 %v333_v22, %s1270_s30 }
 0x131   : > { %v357_v28 = vsel %vm342_vm1, %v339_v14, %v356_v25 }
 0x132   : > { %v365_v30 = vperm.slane %v357_v28, %v1419_v15  ;;  %v366_v31 = vrot.slane %v361_v27, 4  ;;  %v369_v32 = vsel %vm342_vm1, %v361_v27, %v368_v26 }
 0x133   : > { %v377_v33 = vperm.slane %v369_v32, %v1424_v23 }
 0x134   : > { %v367_v34 = vsel %vm342_vm1, %v366_v31, %v349_v19  ;;  %v378_v35 = vrot.slane %v365_v30, 4  ;;  %v381_v36 = vsel %vm342_vm1, %v365_v30, %v380_v29 }
 0x135   : > { %v373_v37 = vperm.slane %v367_v34, %v1424_v23  ;;  %v389_v38 = vperm.slane %v381_v36, %v1424_v23  ;;  %v392_v39 = vrot.slane %v377_v33, 4 }
 0x136   : > { %v379_v40 = vsel %vm342_vm1, %v378_v35, %v353_v21 }
 0x137   : > { %v385_v41 = vperm.slane %v379_v40, %v1424_v23  ;;  %v390_v42 = vrot.slane %v373_v37, 4  ;;  %v393_v43 = vsel %vm342_vm1, 0.0, %v392_v39  ;;  %v396_v44 = vrot.slane %v389_v38, 4 }
 0x138   : > { %v398_v45 = vsel %vm342_vm1, %v392_v39, %v373_v37  ;;  %v403_v46 = vrot.slane %v393_v43, 4  ;;  %589 = vrot.lane.b32.xlu1 %v339_v14, %s1267_s12  ;;  %s710_s12 = scalar_lea.sflag [#allocation4], %s1401_s8 }
 0x139   : > { %v391_v47 = vsel %vm342_vm1, 0.0, %v390_v42  ;;  %v394_v48 = vrot.slane %v385_v41, 4  ;;  %v397_v49 = vsel %vm342_vm1, 0.0, %v396_v44  ;;  %v402_v50 = vperm.slane %v398_v45, %v1419_v15 }
 0x13a   : > { %v404_v51 = vsel %vm342_vm1, %v403_v46, %v391_v47  ;;  %v409_v52 = vsel %vm342_vm1, %v396_v44, %v385_v41  ;;  %v414_v53 = vrot.slane %v397_v49, 4 }
 0x13b   : > { %v395_v54 = vsel %vm342_vm1, 0.0, %v394_v48  ;;  %v408_v55 = vperm.slane %v404_v51, %v1419_v15  ;;  %v413_v56 = vperm.slane %v409_v52, %v1419_v15  ;;  %v422_v57 = vrot.slane %v402_v50, 4 }
 0x13c   : > { %v415_v58 = vsel %vm342_vm1, %v414_v53, %v395_v54 }
 0x13d   : > { %v419_v59 = vperm.slane %v415_v58, %v1419_v15  ;;  %v420_v60 = vrot.slane %v408_v55, 4  ;;  %v423_v61 = vsel %vm342_vm1, %v408_v55, %v422_v57  ;;  %v434_v62 = vrot.slane %v413_v56, 4 }
 0x13e   : > { %v431_v63 = vperm.slane %v423_v61, %v1424_v23 }
 0x13f   : > { %v421_v0 = vsel %vm342_vm1, %v420_v60, %v402_v50  ;;  %v432_v1 = vrot.slane %v419_v59, 4  ;;  %v435_v2 = vsel %vm342_vm1, %v419_v59, %v434_v62 }
 0x140   : > { %v427_v3 = vperm.slane %v421_v0, %v1424_v23  ;;  %v443_v4 = vperm.slane %v435_v2, %v1424_v23  ;;  %v450_v5 = vrot.slane %v431_v63, 4 }
 0x141   : > { %v433_v6 = vsel %vm342_vm1, %v432_v1, %v413_v56 }
 0x142   : > { %v439_v7 = vperm.slane %v433_v6, %v1424_v23  ;;  %v446_v8 = vrot.slane %v427_v3, 4  ;;  %v448_v9 = vrot.slane %v443_v4, 4  ;;  %v451_v10 = vsel %vm342_vm1, %v443_v4, %v450_v5 }
 0x143   : > { %456 = vst.msk [vmem:[%s283_s13 + $0x18] sm:$0xff] %vm452_vm2, %v451_v10 }
 0x144   : > { %v444_v11 = vrot.slane %v439_v7, 4  ;;  %v447_v12 = vsel %vm342_vm1, %v439_v7, %v446_v8  ;;  %v449_v13 = vsel %vm342_vm1, %v448_v9, %v431_v63 }
 0x145   : > { %454 = vst.msk [vmem:[%s283_s13 + $0x8] sm:$0xff] %vm452_vm2, %v447_v12 }
 0x146   : > { %v445_v14 = vsel %vm342_vm1, %v444_v11, %v427_v3  ;;  %455 = vst.msk [vmem:[%s283_s13 + $0x10] sm:$0xff] %vm452_vm2, %v449_v13 }
 0x147   : > { %453 = vst.msk [vmem:[%s283_s13] sm:$0xff] %vm452_vm2, %v445_v14 }
 0x148   : > { %1143 = shalt.err (!%p1140_p13)
}
 0x149   : > { %s1274_s8 = smov 128   ;;  %s1275_s13 = smov 8   ;;  %v584_v16 = vpop.permute.xlu2 %583  ;;  %v458_v18 = vpop.permute.xlu1 %457 }
 0x14a   : > { %967 = dma.vmem_to_hbm [thread:$0]  (%p1379_p4), %s734_s28, 512, %s736_s11, %s710_s12, %s1274_s8, %s1274_s8, %s1275_s13   ;;  %v471_v20 = vrot.slane %v458_v18, 4  ;;  %v597_v27 = vrot.slane %v584_v16, 4 }
 0x14b   : > { %s750_s27 = scalar_lea.hbm %s1670_s4, %s1473_s10  ;;  %s714_s26 = sand.u32 1, %s1337_s24  }
 0x14c   : > { %s290_s25 = scalar_lea.vmem [#allocation8], %s1454_s7  ;;  %s1554_s11 = sshll.u32 %s750_s27, 4  ;;  %s754_s11 = int_to_ptr.hbm [resolvable:$true] %s1554_s11 }
 0x14d   : > { %s751_s28 = sshll.u32 %s290_s25, 4  ;;  %s1579_s12 = scalar_lea.sflag [#allocation9], %s714_s26  ;;  %s1564_s28 = int_to_ptr.vmem [resolvable:$true] %s751_s28 }
 0x14e   : > { %s1158_s17 = sshra.s32 %s754_s11, 4  ;;  %s1164_s6 = scalar_lea.hbm %s1670_s4, 64  ;;  %s1159_s17 = int_to_ptr.hbm [resolvable:$true] %s1158_s17 }
 0x14f   : > { %s1160_s29 = scalar_lea.hbm %s1159_s17, 32  ;;  %p1165_p8 = scmp.lt.s32.totalorder %s1159_s17, %s1670_s4 }
 0x150   : > { %p1161_p0 = scmp.ne.s32.totalorder %s1159_s17, %s1160_s29  ;;  %p1166_p1 = scmp.lt.s32.totalorder %s1164_s6, %s1160_s29 }
 0x152   : > { %p1162_p2 = pnand %p1161_p0, %p1379_p4  ;;  %p1167_p3 = por %p1166_p1, %p1165_p8 }
 0x154   : > { %p1163_p5 = pneg %p1162_p2 }
 0x156   : > { %p1168_p9 = pnand %p1167_p3, %p1163_p5 }
 0x181   : > { %v462_v17 = vpop.permute.xlu2 %461 }
 0x182   : > { %v469_v19 = vrot.slane %v462_v17, 4  ;;  %v472_v24 = vsel %vm342_vm1, %v462_v17, %v471_v20 }
 0x183   : > { %v480_v28 = vperm.slane %v472_v24, %v1419_v15 }
 0x184   : > { %v470_v21 = vsel %vm342_vm1, %v469_v19, %v458_v18 }
 0x185   : > { %v476_v26 = vperm.slane %v470_v21, %v1419_v15  ;;  %v507_v37 = vrot.slane %v480_v28, 4 }
 0x187   : > { %v495_v35 = vrot.slane %v476_v26, 4 }
 0x189   : > { %v464_v25 = vpop.permute.xlu2 %463 }
 0x18a   : > { %v481_v29 = vrot.slane %v464_v25, 4 }
 0x199   : > { %v588_v22 = vpop.permute.xlu0 %587 }
 0x19a   : > { %v595_v31 = vrot.slane %v588_v22, 4  ;;  %v598_v32 = vsel %vm342_vm1, %v588_v22, %v597_v27 }
 0x19b   : > { %v1502_v39 = vperm.slane %v598_v32, %v1419_v15 }
 0x19c   : > { %v596_v43 = vsel %vm342_vm1, %v595_v31, %v584_v16 }
 0x19d   : > { %v602_v52 = vperm.slane %v596_v43, %v1419_v15  ;;  %v633_v53 = vrot.slane %v1502_v39, 4 }
 0x19f   : > { %v621_v13 = vrot.slane %v602_v52, 4 }
 0x1a1   : > { %v586_v45 = vpop.permute.xlu0 %585 }
 0x1a2   : > { %v460_v30 = vpop.permute.xlu1 %459  ;;  %v609_v55 = vrot.slane %v586_v45, 4 }
 0x1a3   : > { %v482_v33 = vsel %vm342_vm1, %v481_v29, %v460_v30  ;;  %v483_v34 = vrot.slane %v460_v30, 4 }
 0x1a4   : > { %v488_v36 = vperm.slane %v482_v33, %v1419_v15 }
 0x1a5   : > { %v484_v38 = vsel %vm342_vm1, %v464_v25, %v483_v34 }
 0x1a6   : > { %v492_v40 = vperm.slane %v484_v38, %v1419_v15  ;;  %v493_v41 = vrot.slane %v488_v36, 4  ;;  %v496_v42 = vsel %vm342_vm1, %v488_v36, %v495_v35 }
 0x1a7   : > { %v504_v44 = vperm.slane %v496_v42, %v1424_v23 }
 0x1a8   : > { %v494_v46 = vsel %vm342_vm1, %v493_v41, %v476_v26  ;;  %v505_v47 = vrot.slane %v492_v40, 4  ;;  %v508_v48 = vsel %vm342_vm1, %v492_v40, %v507_v37 }
 0x1a9   : > { %v500_v49 = vperm.slane %v494_v46, %v1424_v23  ;;  %v516_v50 = vperm.slane %v508_v48, %v1424_v23  ;;  %v519_v51 = vrot.slane %v504_v44, 4 }
 0x1aa   : > { %v506_v54 = vsel %vm342_vm1, %v505_v47, %v480_v28  ;;  %v590_v56 = vpop.permute.xlu1 %589 }
 0x1ab   : > { %v512_v57 = vperm.slane %v506_v54, %v1424_v23  ;;  %v517_v58 = vrot.slane %v500_v49, 4  ;;  %v520_v59 = vsel %vm342_vm1, 0.0, %v519_v51  ;;  %v523_v60 = vrot.slane %v516_v50, 4 }
 0x1ac   : > { %v525_v61 = vsel %vm342_vm1, %v519_v51, %v500_v49  ;;  %v530_v62 = vrot.slane %v520_v59, 4  ;;  %v607_v63 = vrot.slane %v590_v56, 4  ;;  %v610_v0 = vsel %vm342_vm1, %v590_v56, %v609_v55 }
 0x1ad   : > { %v518_v1 = vsel %vm342_vm1, 0.0, %v517_v58  ;;  %v521_v2 = vrot.slane %v512_v57, 4  ;;  %v524_v3 = vsel %vm342_vm1, 0.0, %v523_v60  ;;  %v529_v4 = vperm.slane %v525_v61, %v1419_v15 }
 0x1ae   : > { %v531_v5 = vsel %vm342_vm1, %v530_v62, %v518_v1  ;;  %v536_v6 = vsel %vm342_vm1, %v523_v60, %v512_v57  ;;  %v541_v7 = vrot.slane %v524_v3, 4  ;;  %v608_v8 = vsel %vm342_vm1, %v607_v63, %v586_v45 }
 0x1af   : > { %v522_v9 = vsel %vm342_vm1, 0.0, %v521_v2  ;;  %v535_v10 = vperm.slane %v531_v5, %v1419_v15  ;;  %v540_v11 = vperm.slane %v536_v6, %v1419_v15  ;;  %v549_v12 = vrot.slane %v529_v4, 4 }
 0x1b0   : > { %v542_v14 = vsel %vm342_vm1, %v541_v7, %v522_v9  ;;  %v614_v16 = vperm.slane %v608_v8, %v1419_v15  ;;  %v618_v17 = vperm.slane %v610_v0, %v1419_v15 }
 0x1b1   : > { %v546_v18 = vperm.slane %v542_v14, %v1419_v15  ;;  %v547_v19 = vrot.slane %v535_v10, 4  ;;  %v550_v20 = vsel %vm342_vm1, %v535_v10, %v549_v12  ;;  %v561_v21 = vrot.slane %v540_v11, 4 }
 0x1b2   : > { %v558_v22 = vperm.slane %v550_v20, %v1424_v23  ;;  %v619_v24 = vrot.slane %v614_v16, 4  ;;  %v622_v25 = vsel %vm342_vm1, %v614_v16, %v621_v13  ;;  %v631_v26 = vrot.slane %v618_v17, 4 }
 0x1b3   : > { %v548_v27 = vsel %vm342_vm1, %v547_v19, %v529_v4  ;;  %v559_v28 = vrot.slane %v546_v18, 4  ;;  %v562_v29 = vsel %vm342_vm1, %v546_v18, %v561_v21  ;;  %v630_v30 = vperm.slane %v622_v25, %v1424_v23 }
 0x1b4   : > { %v554_v31 = vperm.slane %v548_v27, %v1424_v23  ;;  %v570_v32 = vperm.slane %v562_v29, %v1424_v23  ;;  %v577_v33 = vrot.slane %v558_v22, 4  ;;  %v620_v34 = vsel %vm342_vm1, %v619_v24, %v602_v52 }
 0x1b5   : > { %v560_v35 = vsel %vm342_vm1, %v559_v28, %v540_v11  ;;  %v626_v36 = vperm.slane %v620_v34, %v1424_v23  ;;  %v632_v37 = vsel %vm342_vm1, %v631_v26, %v1502_v39  ;;  %v634_v38 = vsel %vm342_vm1, %v618_v17, %v633_v53 }
 0x1b6   : > { %v566_v40 = vperm.slane %v560_v35, %v1424_v23  ;;  %v573_v41 = vrot.slane %v554_v31, 4  ;;  %v575_v42 = vrot.slane %v570_v32, 4  ;;  %v578_v43 = vsel %vm342_vm1, %v570_v32, %v577_v33 }
 0x1b7   : > { %v638_v44 = vperm.slane %v632_v37, %v1424_v23  ;;  %v642_v45 = vperm.slane %v634_v38, %v1424_v23  ;;  %v643_v46 = vrot.slane %v626_v36, 4  ;;  %v645_v39 = vrot.slane %v630_v30, 4  ;;  %582 = vst.msk [vmem:[%s290_s25 + $0x18] sm:$0xff] %vm452_vm2, %v578_v43 }
 0x1b8   : > { %v571_v47 = vrot.slane %v566_v40, 4  ;;  %v574_v48 = vsel %vm342_vm1, %v566_v40, %v573_v41  ;;  %v576_v49 = vsel %vm342_vm1, %v575_v42, %v558_v22 }
 0x1b9   : > { %v644_v50 = vsel %vm342_vm1, 0.0, %v643_v46  ;;  %v646_v51 = vsel %vm342_vm1, 0.0, %v645_v39  ;;  %v647_v52 = vrot.slane %v638_v44, 4  ;;  %v649_v53 = vrot.slane %v642_v45, 4  ;;  %580 = vst.msk [vmem:[%s290_s25 + $0x8] sm:$0xff] %vm452_vm2, %v574_v48 }
 0x1ba   : > { %v572_v54 = vsel %vm342_vm1, %v571_v47, %v554_v31  ;;  %v651_v55 = vsel %vm342_vm1, %v645_v39, %v626_v36  ;;  %v656_v56 = vrot.slane %v646_v51, 4  ;;  %581 = vst.msk [vmem:[%s290_s25 + $0x10] sm:$0xff] %vm452_vm2, %v576_v49 }
 0x1bb   : > { %v648_v57 = vsel %vm342_vm1, 0.0, %v647_v52  ;;  %v650_v58 = vsel %vm342_vm1, 0.0, %v649_v53  ;;  %v655_v59 = vperm.slane %v651_v55, %v1419_v15  ;;  %v662_v60 = vsel %vm342_vm1, %v649_v53, %v638_v44  ;;  %579 = vst.msk [vmem:[%s290_s25] sm:$0xff] %vm452_vm2, %v572_v54 }
 0x1bc   : > { %v657_v61 = vsel %vm342_vm1, %v656_v56, %v644_v50  ;;  %v666_v62 = vperm.slane %v662_v60, %v1419_v15  ;;  %v667_v63 = vrot.slane %v650_v58, 4 }
 0x1bd   : > { %1171 = shalt.err (!%p1168_p9)
}
 0x1be   : > { %968 = dma.vmem_to_hbm [thread:$0]  (%p1379_p4), %s1564_s28, 512, %s754_s11, %s1579_s12, %s1274_s8, %s1274_s8, %s1275_s13   ;;  %v661_v0 = vperm.slane %v657_v61, %v1419_v15  ;;  %v675_v1 = vrot.slane %v655_v59, 4  ;;  %v668_v2 = vsel %vm342_vm1, %v667_v63, %v648_v57  ;;  %v687_v3 = vrot.slane %v666_v62, 4 }
 0x1bf   : > { %v672_v4 = vperm.slane %v668_v2, %v1419_v15  ;;  %s768_s26 = scalar_lea.hbm %s1671_s5, %s1473_s10  ;;  %s297_s28 = scalar_lea.vmem [#allocation10], %s1454_s7 }
 0x1c0   : > { %v673_v5 = vrot.slane %v661_v0, 4  ;;  %v676_v6 = vsel %vm342_vm1, %v661_v0, %v675_v1  ;;  %s1616_s25 = sshll.u32 %s768_s26, 4  ;;  %s769_s11 = sshll.u32 %s297_s28, 4  ;;  %s770_s11 = int_to_ptr.vmem [resolvable:$true] %s769_s11  ;;  %s772_s25 = int_to_ptr.hbm [resolvable:$true] %s1616_s25 }
 0x1c1   : > { %v684_v7 = vperm.slane %v676_v6, %v1424_v23  ;;  %v685_v9 = vrot.slane %v672_v4, 4  ;;  %v688_v10 = vsel %vm342_vm1, %v672_v4, %v687_v3  ;;  %s1186_s7 = sshra.s32 %s772_s25, 4  ;;  %s1192_s30 = scalar_lea.hbm %s1671_s5, 64  ;;  %s1187_s7 = int_to_ptr.hbm [resolvable:$true] %s1186_s7 }
 0x1c2   : > { %v674_v8 = vsel %vm342_vm1, %v673_v5, %v655_v59  ;;  %v696_v12 = vperm.slane %v688_v10, %v1424_v23  ;;  %s1188_s10 = scalar_lea.hbm %s1187_s7, 32  ;;  %p1193_p13 = scmp.lt.s32.totalorder %s1187_s7, %s1671_s5 }
 0x1c3   : > { %v680_v11 = vperm.slane %v674_v8, %v1424_v23  ;;  %v703_v15 = vrot.slane %v684_v7, 4  ;;  %v686_v13 = vsel %vm342_vm1, %v685_v9, %v666_v62  ;;  %p1189_p10 = scmp.ne.s32.totalorder %s1187_s7, %s1188_s10  ;;  %p1194_p0 = scmp.lt.s32.totalorder %s1192_s30, %s1188_s10 }
 0x1c4   : > { %v692_v14 = vperm.slane %v686_v13, %v1424_v23  ;;  %v701_v17 = vrot.slane %v696_v12, 4 }
 0x1c5   : > { %v699_v16 = vrot.slane %v680_v11, 4  ;;  %v704_v18 = vsel %vm342_vm1, %v696_v12, %v703_v15  ;;  %p1190_p11 = pnand %p1189_p10, %p1379_p4  ;;  %p1195_p2 = por %p1194_p0, %p1193_p13 }
 0x1c6   : > { %708 = vst.msk [vmem:[%s297_s28 + $0x18] sm:$0xff] %vm452_vm2, %v704_v18  ;;  %v697_v19 = vrot.slane %v692_v14, 4  ;;  %v702_v21 = vsel %vm342_vm1, %v701_v17, %v684_v7 }
 0x1c7   : > { %v700_v20 = vsel %vm342_vm1, %v692_v14, %v699_v16  ;;  %707 = vst.msk [vmem:[%s297_s28 + $0x10] sm:$0xff] %vm452_vm2, %v702_v21  ;;  %p1191_p12 = pneg %p1190_p11 }
 0x1c8   : > { %706 = vst.msk [vmem:[%s297_s28 + $0x8] sm:$0xff] %vm452_vm2, %v700_v20  ;;  %v698_v23 = vsel %vm342_vm1, %v697_v19, %v680_v11 }
 0x1c9   : > { %705 = vst.msk [vmem:[%s297_s28] sm:$0xff] %vm452_vm2, %v698_v23  ;;  %p1196_p5 = pnand %p1195_p2, %p1191_p12 }
 0x1cb   : > { %1199 = shalt.err (!%p1196_p5)
}
 0x1cc   : > { %969 = dma.vmem_to_hbm [thread:$0]  (%p1379_p4), %s770_s11, 512, %s772_s25, %s1579_s12, %s1274_s8, %s1274_s8, %s1275_s13  }
 0x1cd PF: > { %s786_s0 = sand.u32 1, %s1242_s18   ;;  %p982_p8 = pnand %p937_p6, %p1387_p7 }
 0x1ce   : > { %s787_s1 = scalar_lea.sflag [#allocation4], %s786_s0 }
 0x1cf   : > { %p983_p1 = pneg %p982_p8 }
 0x1d1   : > { %1233 = dma.done.wait (%p983_p1), %s787_s1, 512  }
 0x1d2   : > { %1235 = vsyncadd (%p983_p1), %s787_s1, 4294966784  ;;  %s1682_s24 = sadd.s32 4294967294, %s1262_s23  }
 0x1d3   : > { %s796_s14 = sand.u32 1, %s1682_s24  }
 0x1d4   : > { %s797_s27 = scalar_lea.sflag [#allocation9], %s796_s14 }
 0x1d5   : > { %1237 = dma.done.wait (%p983_p1), %s797_s27, 1024  }
 0x1d6   : > { %1239 = vsyncadd (%p983_p1), %s797_s27, 4294966272  ;;  %s26_s23 = sadd.s32 1, %s1262_s23   ;;  %s1683_s18 = smov %s1246_s19 }
 0x1d7   : > { %p23_p4 = scmp.ge.s32.totalorder %s26_s23, 4   ;;  %s1684_s19 = smov %s1250_s20 }
 0x1d8   : > { %s1685_s20 = smov %s1385_s15  ;;  %s1686_s21 = smov %s1258_s22 }
 0x1d9   : > { %s1687_s22 = smov %s1689_s9  ;;  %25 = sbr.rel (!%p23_p4) target bundleno = 12 (0xc), region = 113 }
 0x1de   :  { %813 = vsyncpa [#allocation3], 1 }
 0x1df   :  { %815 = vsyncpa [#allocation3 + $0x1], 1 }
 0x1e0   :  { %816 = vsyncpa [#allocation6], 1 }
 0x1e1   :  { %817 = vsyncpa [#allocation4], 1 }
 0x1e2   :  { %819 = vsyncpa [#allocation4 + $0x1], 1 }
 0x1e3   :  { %820 = vsyncpa [#allocation9], 1 }
 0x1e4   :  { %822 = vsyncpa [#allocation9 + $0x1], 1 }

</bundles_post_ra>
